<compile_context>
chip_gen: v7x
topology: tpu7x:2x2x1
jax: 0.10.0
libtpu: 0.0.40
codegen_flags: <defaults>
</compile_context>

<pallas_src>
import jax
import jax.numpy as jnp
from jax.experimental import pallas as pl
from jax.experimental.pallas import tpu as pltpu


def _round_up(x, m):
    return (x + m - 1) // m * m


# ----------------------------------------------------------------------------
# Pallas kernel: 3 hidden matmul+bias+ReLU layers + linear head.
# PE is already folded into the weights/biases by the wrapper, so the body is
# pure matmul/bias/relu.  Runs once per batch tile.
# ----------------------------------------------------------------------------
def _mlp_pe_kernel(x_ref,
                   w1_ref, b1_ref,
                   w2_ref, b2_ref,
                   w3_ref, b3_ref,
                   w4_ref, b4_ref,
                   hs0_ref, out_ref):
    h = jnp.dot(x_ref[...], w1_ref[...],
                preferred_element_type=jnp.float32) + b1_ref[...]
    h = jnp.maximum(h, 0.0)                                   # ReLU (layer 1)

    h = jnp.dot(h.astype(jnp.bfloat16), w2_ref[...],
                preferred_element_type=jnp.float32) + b2_ref[...]
    h = jnp.maximum(h, 0.0)                                   # ReLU (layer 3)

    h = jnp.dot(h.astype(jnp.bfloat16), w3_ref[...],
                preferred_element_type=jnp.float32) + b3_ref[...]
    h = jnp.maximum(h, 0.0)                                   # ReLU (layer 5)

    hs0_ref[...] = h                                          # pre-head capture

    out_ref[...] = (jnp.dot(h.astype(jnp.bfloat16), w4_ref[...],
                            preferred_element_type=jnp.float32)
                    + b4_ref[...])


# ----------------------------------------------------------------------------
# JAX wrapper: PE folding, head padding, bf16 casts, batch-tiled pallas_call.
# ----------------------------------------------------------------------------
def mlp_pe_forward(x, params, pes, *, pe_op="add", batch_tile=512):
    """Run MLPPENet.forward with one batch-tiled Pallas call.

    x       : (B, input_size) float32
    params  : dict with W1..W4 already transposed to (in, out), b1..b4 (1, out)
    pes     : list of 3 arrays, each (1, n_hidden)
    returns : (hs0, out)  shapes (B, n_hidden) f32, (B, n_classes) f32
    """
    B, D = x.shape
    H = params["W1"].shape[1]
    C = params["W4"].shape[1]

    # ---- Fold PE into the layer it follows (algebraically exact) -----------
    #   relu((xW + b) + pe) == relu(xW + (b + pe))
    #   relu((xW + b) * pe) == relu(x(W*pe) + b*pe)
    def fold(W, b, pe):
        if pe_op == "add":
            return W, b + pe
        if pe_op == "mul":
            return W * pe, b * pe
        return W, b        # any other pe_op: pass-through (matches PyTorch)

    W1, b1 = fold(params["W1"], params["b1"], pes[0])
    W2, b2 = fold(params["W2"], params["b2"], pes[1])
    W3, b3 = fold(params["W3"], params["b3"], pes[2])
    W4, b4 = params["W4"], params["b4"]

    # ---- Pad the head to a lane-dense output width --------------------------
    Cp = _round_up(C, 128)
    if Cp != C:
        W4 = jnp.pad(W4, ((0, 0), (0, Cp - C)))
        b4 = jnp.pad(b4, ((0, 0), (0, Cp - C)))

    # ---- dtype plan: bf16 weights/activations, f32 biases & accumulation ----
    bf = jnp.bfloat16
    x_b = x.astype(bf)
    W1, W2, W3, W4 = (w.astype(bf) for w in (W1, W2, W3, W4))
    b1, b2, b3, b4 = (b.astype(jnp.float32) for b in (b1, b2, b3, b4))

    # ---- Batch tiling --------------------------------------------------------
    TB = min(batch_tile, _round_up(B, 8))   # sublane-aligned batch tile
    Bp = _round_up(B, TB)
    if Bp != B:
        x_b = jnp.pad(x_b, ((0, Bp - B), (0, 0)))
    grid = (Bp // TB,)

    const = lambda i: (0, 0)     # weights/biases: same block every step (stay resident)
    batch = lambda i: (i, 0)     # activations/outputs: tiled along batch

    flops = 2 * Bp * (D * H + 2 * H * H + H * Cp)
    bytes_accessed = (x_b.size * 2
                      + (W1.size + W2.size + W3.size + W4.size) * 2
                      + (b1.size + b2.size + b3.size + b4.size) * 4
                      + Bp * H * 4 + Bp * Cp * 4)

    hs0, out = pl.pallas_call(
        _mlp_pe_kernel,
        grid=grid,
        in_specs=[
            pl.BlockSpec((TB, D), batch),
            pl.BlockSpec((D, H), const), pl.BlockSpec((1, H), const),
            pl.BlockSpec((H, H), const), pl.BlockSpec((1, H), const),
            pl.BlockSpec((H, H), const), pl.BlockSpec((1, H), const),
            pl.BlockSpec((H, Cp), const), pl.BlockSpec((1, Cp), const),
        ],
        out_specs=(
            pl.BlockSpec((TB, H), batch),
            pl.BlockSpec((TB, Cp), batch),
        ),
        out_shape=(
            jax.ShapeDtypeStruct((Bp, H), jnp.float32),
            jax.ShapeDtypeStruct((Bp, Cp), jnp.float32),
        ),
        compiler_params=pltpu.CompilerParams(
            dimension_semantics=("parallel",)),
        cost_estimate=pl.CostEstimate(flops=flops, transcendentals=0,
                                      bytes_accessed=bytes_accessed),
    )(x_b, W1, b1, W2, b2, W3, b3, W4, b4)

    return hs0[:B], out[:B, :C]


# ----------------------------------------------------------------------------
# Parameter / PE construction (deterministic, in-script).
# ----------------------------------------------------------------------------
def init_linear(key, fan_in, fan_out):
    """PyTorch-style uniform(-1/sqrt(fan_in), 1/sqrt(fan_in)) init."""
    kw, kb = jax.random.split(key)
    bound = 1.0 / jnp.sqrt(jnp.float32(fan_in))
    # Weight returned already transposed to (in, out).
    W = jax.random.uniform(kw, (fan_in, fan_out), jnp.float32, -bound, bound)
    b = jax.random.uniform(kb, (1, fan_out), jnp.float32, -bound, bound)
    return W, b


def sin_pe(n_hidden, *, pe_t=1.0, pe_ratio=1.0, pe_alpha=1.0):
    # TODO(synk): `sin_pe_func` is not defined in the provided source; this is
    # a deterministic sinusoidal stand-in (alpha*sin(i/t), first pe_ratio
    # fraction active).  The kernel is agnostic to the exact PE values since
    # the PE is folded into the weights/bias in the wrapper.
    pos = jnp.arange(n_hidden, dtype=jnp.float32)
    pe = pe_alpha * jnp.sin(pos / jnp.float32(pe_t))
    n_active = int(n_hidden * pe_ratio)
    pe = jnp.where(pos < n_active, pe, 0.0)
    return pe.reshape(1, -1)


# ----------------------------------------------------------------------------
# Pure-JAX reference mirroring the kernel's dtype plan (bf16 matmuls, f32
# accumulation / bias / PE), with the PE applied UN-folded -> validates both
# the kernel plumbing and the PE-folding algebra.
# ----------------------------------------------------------------------------
def reference_forward(x, params, pes, pe_op="add"):
    def apply_pe(h, pe):
        if pe_op == "add":
            return h + pe
        if pe_op == "mul":
            return h * pe
        return h

    def mm(a, w):
        return jnp.dot(a.astype(jnp.bfloat16), w.astype(jnp.bfloat16),
                       preferred_element_type=jnp.float32)

    h = jnp.maximum(apply_pe(mm(x, params["W1"]) + params["b1"], pes[0]), 0.0)
    h = jnp.maximum(apply_pe(mm(h, params["W2"]) + params["b2"], pes[1]), 0.0)
    h = jnp.maximum(apply_pe(mm(h, params["W3"]) + params["b3"], pes[2]), 0.0)
    hs0 = h
    out = mm(h, params["W4"]) + params["b4"]
    return hs0, out


if __name__ == "__main__":
    # Small shapes consistent with the module (flattened input, 3 hidden FC,
    # classifier head).  B=20 with batch_tile=8 exercises the batch grid
    # (3 steps) and the batch-padding path.
    B, INPUT, HIDDEN, CLASSES = 20, 128, 128, 10
    PE_T, PE_RATIO, PE_ALPHA = 1.0, 1.0, 1.0

    root = jax.random.PRNGKey(0)
    kx, k1, k2, k3, k4 = jax.random.split(root, 5)

    # Input: the model flattens whatever comes in; give it already-flat (B, INPUT).
    x = jax.random.normal(kx, (B, INPUT), dtype=jnp.float32)

    W1, b1 = init_linear(k1, INPUT, HIDDEN)
    W2, b2 = init_linear(k2, HIDDEN, HIDDEN)
    W3, b3 = init_linear(k3, HIDDEN, HIDDEN)
    W4, b4 = init_linear(k4, HIDDEN, CLASSES)
    params = dict(W1=W1, b1=b1, W2=W2, b2=b2, W3=W3, b3=b3, W4=W4, b4=b4)

    pes = [sin_pe(HIDDEN, pe_t=PE_T, pe_ratio=PE_RATIO, pe_alpha=PE_ALPHA)
           for _ in range(3)]

    # Validate both PE folding paths (add and mul).
    for pe_op in ("add", "mul"):
        hs0, out = mlp_pe_forward(x, params, pes, pe_op=pe_op, batch_tile=8)
        jax.block_until_ready((hs0, out))

        hs0_ref, out_ref = reference_forward(x, params, pes, pe_op=pe_op)
        assert hs0.shape == (B, HIDDEN) and out.shape == (B, CLASSES)
        assert jnp.allclose(hs0, hs0_ref, atol=2e-3, rtol=2e-3), pe_op
        assert jnp.allclose(out, out_ref, atol=2e-3, rtol=2e-3), pe_op

    print("KERNEL_OK")
</pallas_src>

<mosaic_0001>
module attributes {stable_mosaic.version = 11 : i64} {
  func.func @_mlp_pe_kernel(%arg0: i32, %arg1: memref<8x128xbf16, #tpu.memory_space<vmem>>, %arg2: memref<128x128xbf16, #tpu.memory_space<vmem>>, %arg3: memref<1x128xf32, #tpu.memory_space<vmem>>, %arg4: memref<128x128xbf16, #tpu.memory_space<vmem>>, %arg5: memref<1x128xf32, #tpu.memory_space<vmem>>, %arg6: memref<128x128xbf16, #tpu.memory_space<vmem>>, %arg7: memref<1x128xf32, #tpu.memory_space<vmem>>, %arg8: memref<128x128xbf16, #tpu.memory_space<vmem>>, %arg9: memref<1x128xf32, #tpu.memory_space<vmem>>, %arg10: memref<8x128xf32, #tpu.memory_space<vmem>>, %arg11: memref<8x128xf32, #tpu.memory_space<vmem>>) attributes {dimension_semantics = [#tpu.dimension_semantics<parallel>], iteration_bounds = array<i64: 3>, scalar_prefetch = 0 : i64, scratch_operands = 0 : i64, tpu.core_type = #tpu.core_type<tc>, window_params = [{transform_indices = @transform_0, window_bounds = array<i64: 8, 128>}, {pipeline_mode = #tpu.pipeline_mode<synchronous>, transform_indices = @transform_1, window_bounds = array<i64: 128, 128>}, {pipeline_mode = #tpu.pipeline_mode<synchronous>, transform_indices = @transform_2, window_bounds = array<i64: 1, 128>}, {pipeline_mode = #tpu.pipeline_mode<synchronous>, transform_indices = @transform_3, window_bounds = array<i64: 128, 128>}, {pipeline_mode = #tpu.pipeline_mode<synchronous>, transform_indices = @transform_4, window_bounds = array<i64: 1, 128>}, {pipeline_mode = #tpu.pipeline_mode<synchronous>, transform_indices = @transform_5, window_bounds = array<i64: 128, 128>}, {pipeline_mode = #tpu.pipeline_mode<synchronous>, transform_indices = @transform_6, window_bounds = array<i64: 1, 128>}, {pipeline_mode = #tpu.pipeline_mode<synchronous>, transform_indices = @transform_7, window_bounds = array<i64: 128, 128>}, {pipeline_mode = #tpu.pipeline_mode<synchronous>, transform_indices = @transform_8, window_bounds = array<i64: 1, 128>}, {transform_indices = @transform_9, window_bounds = array<i64: 8, 128>}, {transform_indices = @transform_10, window_bounds = array<i64: 8, 128>}]} {
    %c0 = arith.constant 0 : index
    %c0_0 = arith.constant 0 : index
    %0 = vector.load %arg1[%c0, %c0_0] : memref<8x128xbf16, #tpu.memory_space<vmem>>, vector<8x128xbf16>
    %c0_1 = arith.constant 0 : index
    %c0_2 = arith.constant 0 : index
    %1 = vector.load %arg2[%c0_1, %c0_2] : memref<128x128xbf16, #tpu.memory_space<vmem>>, vector<128x128xbf16>
    %cst = arith.constant dense<0.000000e+00> : vector<8x128xf32>
    %2 = tpu.matmul %0, %1, %cst {dimension_numbers = #tpu.dot_dimension_numbers<[1], [0], [0], [1], [0, 0, 1, 1], [], []>} : vector<8x128xbf16>, vector<128x128xbf16>, vector<8x128xf32> -> vector<8x128xf32>
    %c0_3 = arith.constant 0 : index
    %c0_4 = arith.constant 0 : index
    %3 = vector.load %arg3[%c0_3, %c0_4] : memref<1x128xf32, #tpu.memory_space<vmem>>, vector<1x128xf32>
    %4 = vector.broadcast %3 : vector<1x128xf32> to vector<8x128xf32>
    %5 = arith.addf %2, %4 : vector<8x128xf32>
    %cst_5 = arith.constant 0.000000e+00 : f32
    %6 = vector.broadcast %cst_5 : f32 to vector<8x128xf32>
    %7 = arith.maximumf %5, %6 : vector<8x128xf32>
    %8 = arith.truncf %7 : vector<8x128xf32> to vector<8x128xbf16>
    %c0_6 = arith.constant 0 : index
    %c0_7 = arith.constant 0 : index
    %9 = vector.load %arg4[%c0_6, %c0_7] : memref<128x128xbf16, #tpu.memory_space<vmem>>, vector<128x128xbf16>
    %cst_8 = arith.constant dense<0.000000e+00> : vector<8x128xf32>
    %10 = tpu.matmul %8, %9, %cst_8 {dimension_numbers = #tpu.dot_dimension_numbers<[1], [0], [0], [1], [0, 0, 1, 1], [], []>} : vector<8x128xbf16>, vector<128x128xbf16>, vector<8x128xf32> -> vector<8x128xf32>
    %c0_9 = arith.constant 0 : index
    %c0_10 = arith.constant 0 : index
    %11 = vector.load %arg5[%c0_9, %c0_10] : memref<1x128xf32, #tpu.memory_space<vmem>>, vector<1x128xf32>
    %12 = vector.broadcast %11 : vector<1x128xf32> to vector<8x128xf32>
    %13 = arith.addf %10, %12 : vector<8x128xf32>
    %cst_11 = arith.constant 0.000000e+00 : f32
    %14 = vector.broadcast %cst_11 : f32 to vector<8x128xf32>
    %15 = arith.maximumf %13, %14 : vector<8x128xf32>
    %16 = arith.truncf %15 : vector<8x128xf32> to vector<8x128xbf16>
    %c0_12 = arith.constant 0 : index
    %c0_13 = arith.constant 0 : index
    %17 = vector.load %arg6[%c0_12, %c0_13] : memref<128x128xbf16, #tpu.memory_space<vmem>>, vector<128x128xbf16>
    %cst_14 = arith.constant dense<0.000000e+00> : vector<8x128xf32>
    %18 = tpu.matmul %16, %17, %cst_14 {dimension_numbers = #tpu.dot_dimension_numbers<[1], [0], [0], [1], [0, 0, 1, 1], [], []>} : vector<8x128xbf16>, vector<128x128xbf16>, vector<8x128xf32> -> vector<8x128xf32>
    %c0_15 = arith.constant 0 : index
    %c0_16 = arith.constant 0 : index
    %19 = vector.load %arg7[%c0_15, %c0_16] : memref<1x128xf32, #tpu.memory_space<vmem>>, vector<1x128xf32>
    %20 = vector.broadcast %19 : vector<1x128xf32> to vector<8x128xf32>
    %21 = arith.addf %18, %20 : vector<8x128xf32>
    %cst_17 = arith.constant 0.000000e+00 : f32
    %22 = vector.broadcast %cst_17 : f32 to vector<8x128xf32>
    %23 = arith.maximumf %21, %22 : vector<8x128xf32>
    %c0_18 = arith.constant 0 : index
    %c0_19 = arith.constant 0 : index
    %24 = vector.load %arg10[%c0_18, %c0_19] : memref<8x128xf32, #tpu.memory_space<vmem>>, vector<8x128xf32>
    tpu.vector_store %arg10[%c0_18, %c0_19], %23 {strides = array<i32>} : memref<8x128xf32, #tpu.memory_space<vmem>>, vector<8x128xf32>,
    %25 = arith.truncf %23 : vector<8x128xf32> to vector<8x128xbf16>
    %c0_20 = arith.constant 0 : index
    %c0_21 = arith.constant 0 : index
    %26 = vector.load %arg8[%c0_20, %c0_21] : memref<128x128xbf16, #tpu.memory_space<vmem>>, vector<128x128xbf16>
    %cst_22 = arith.constant dense<0.000000e+00> : vector<8x128xf32>
    %27 = tpu.matmul %25, %26, %cst_22 {dimension_numbers = #tpu.dot_dimension_numbers<[1], [0], [0], [1], [0, 0, 1, 1], [], []>} : vector<8x128xbf16>, vector<128x128xbf16>, vector<8x128xf32> -> vector<8x128xf32>
    %c0_23 = arith.constant 0 : index
    %c0_24 = arith.constant 0 : index
    %28 = vector.load %arg9[%c0_23, %c0_24] : memref<1x128xf32, #tpu.memory_space<vmem>>, vector<1x128xf32>
    %29 = vector.broadcast %28 : vector<1x128xf32> to vector<8x128xf32>
    %30 = arith.addf %27, %29 : vector<8x128xf32>
    %c0_25 = arith.constant 0 : index
    %c0_26 = arith.constant 0 : index
    %31 = vector.load %arg11[%c0_25, %c0_26] : memref<8x128xf32, #tpu.memory_space<vmem>>, vector<8x128xf32>
    tpu.vector_store %arg11[%c0_25, %c0_26], %30 {strides = array<i32>} : memref<8x128xf32, #tpu.memory_space<vmem>>, vector<8x128xf32>,
    return
  }
  func.func @transform_0(%arg0: i32) -> (i32, i32) {
    %c0_i32 = arith.constant 0 : i32
    %c0_i32_0 = arith.constant 0 : i32
    return %arg0, %c0_i32 : i32, i32
  }
  func.func @transform_1(%arg0: i32) -> (i32, i32) {
    %c0_i32 = arith.constant 0 : i32
    %c0_i32_0 = arith.constant 0 : i32
    %c0_i32_1 = arith.constant 0 : i32
    return %c0_i32, %c0_i32_0 : i32, i32
  }
  func.func @transform_2(%arg0: i32) -> (i32, i32) {
    %c0_i32 = arith.constant 0 : i32
    %c0_i32_0 = arith.constant 0 : i32
    %c0_i32_1 = arith.constant 0 : i32
    return %c0_i32, %c0_i32_0 : i32, i32
  }
  func.func @transform_3(%arg0: i32) -> (i32, i32) {
    %c0_i32 = arith.constant 0 : i32
    %c0_i32_0 = arith.constant 0 : i32
    %c0_i32_1 = arith.constant 0 : i32
    return %c0_i32, %c0_i32_0 : i32, i32
  }
  func.func @transform_4(%arg0: i32) -> (i32, i32) {
    %c0_i32 = arith.constant 0 : i32
    %c0_i32_0 = arith.constant 0 : i32
    %c0_i32_1 = arith.constant 0 : i32
    return %c0_i32, %c0_i32_0 : i32, i32
  }
  func.func @transform_5(%arg0: i32) -> (i32, i32) {
    %c0_i32 = arith.constant 0 : i32
    %c0_i32_0 = arith.constant 0 : i32
    %c0_i32_1 = arith.constant 0 : i32
    return %c0_i32, %c0_i32_0 : i32, i32
  }
  func.func @transform_6(%arg0: i32) -> (i32, i32) {
    %c0_i32 = arith.constant 0 : i32
    %c0_i32_0 = arith.constant 0 : i32
    %c0_i32_1 = arith.constant 0 : i32
    return %c0_i32, %c0_i32_0 : i32, i32
  }
  func.func @transform_7(%arg0: i32) -> (i32, i32) {
    %c0_i32 = arith.constant 0 : i32
    %c0_i32_0 = arith.constant 0 : i32
    %c0_i32_1 = arith.constant 0 : i32
    return %c0_i32, %c0_i32_0 : i32, i32
  }
  func.func @transform_8(%arg0: i32) -> (i32, i32) {
    %c0_i32 = arith.constant 0 : i32
    %c0_i32_0 = arith.constant 0 : i32
    %c0_i32_1 = arith.constant 0 : i32
    return %c0_i32, %c0_i32_0 : i32, i32
  }
  func.func @transform_9(%arg0: i32) -> (i32, i32) {
    %c0_i32 = arith.constant 0 : i32
    %c0_i32_0 = arith.constant 0 : i32
    return %arg0, %c0_i32 : i32, i32
  }
  func.func @transform_10(%arg0: i32) -> (i32, i32) {
    %c0_i32 = arith.constant 0 : i32
    %c0_i32_0 = arith.constant 0 : i32
    return %arg0, %c0_i32 : i32, i32
  }
}

</mosaic_0001>

<bundles_post_ra>
// kernel: tpu_custom_call.1
= control target key start
LH: loop header
LB: loop body
LE: loop exit
PB: predicated region body
PF: predicated region fallthrough
CT: control target
= control target key end

     0   :  { %s2066_s0 = inlined_call_operand.hbm [shape: bf16[24,128], index: 0, kind: input, shape index: {}]   ;;  %s2067_s1 = inlined_call_operand.hbm [shape: bf16[128,128], index: 1, kind: input, shape index: {}]   ;;  %s2068_s2 = inlined_call_operand.vmem [shape: f32[1,128], index: 2, kind: input, shape index: {}]   ;;  %s2069_s3 = inlined_call_operand.hbm [shape: bf16[128,128], index: 3, kind: input, shape index: {}]   ;;  %s2070_s4 = inlined_call_operand.vmem [shape: f32[1,128], index: 4, kind: input, shape index: {}]   ;;  %s2071_s5 = inlined_call_operand.hbm [shape: bf16[128,128], index: 5, kind: input, shape index: {}]   ;;  %s2072_s6 = inlined_call_operand.vmem [shape: f32[1,128], index: 6, kind: input, shape index: {}]   ;;  %s2073_s7 = inlined_call_operand.hbm [shape: bf16[128,128], index: 7, kind: input, shape index: {}]   ;;  %s2074_s8 = inlined_call_operand.vmem [shape: f32[1,128], index: 8, kind: input, shape index: {}]   ;;  %s2075_s9 = inlined_call_operand.hbm [shape: f32[24,128], index: 9, kind: output, shape index: {0}]   ;;  %s2076_s10 = inlined_call_operand.hbm [shape: f32[24,128], index: 10, kind: output, shape index: {1}]  }
   0x1   :  { %2081 = sst [smem:[#allocation19_spill]] %s2066_s0 }
   0x2   :  { %2082 = sst [smem:[#allocation20_spill]] %s2067_s1 }
   0x3   :  { %2083 = sst [smem:[#allocation21_spill]] %s2074_s8 }
   0x4   :  { %2084 = sst [smem:[#allocation22_spill]] %s2076_s10 }
   0x5   :  { %16 = vsyncpa [#allocation3], 0 }
   0x6   :  { %18 = vsyncpa [#allocation3 + $0x1], 0 }
   0x7   :  { %19 = vsyncpa [#allocation6], 0 }
   0x8   :  { %20 = vsyncpa [#allocation9], 0 }
   0x9   :  { %21 = vsyncpa [#allocation4], 0 }
   0xa   :  { %23 = vsyncpa [#allocation4 + $0x1], 0 }
   0xb   :  { %24 = vsyncpa [#allocation13], 0 }
   0xc   :  { %26 = vsyncpa [#allocation13 + $0x1], 0  ;;  %s1689_s13 = smov 0   ;;  %s1691_s14 = smov 0  }
   0xd   :  { %s1693_s15 = smov 0   ;;  %s1695_s16 = smov 0  }
   0xe LB: > { %s1623_s17 = smov [#allocation5]   ;;  %s1710_s19 = sadd.s32 4294967295, %s1621_s16   ;;  %s1621_s16 = sphi %s1695_s16, %s2108_s16   ;;  %s1617_s15 = sphi %s1693_s15, %s2107_s15   ;;  %s1613_s14 = sphi %s1691_s14, %s2106_s14   ;;  %s1609_s13 = sphi %s1689_s13, %s2105_s13  }
   0xf   : > { %s295_s18 = sshll.u32 %s1623_s17, 4  ;;  %p1071_p0 = scmp.ge.s32.totalorder %s1621_s16, 1  ;;  %s1715_s18 = int_to_ptr.vmem [resolvable:$true] %s295_s18 }
  0x10   : > { %p2078_p1 = scmp.eq.s32.totalorder %s1710_s19, 0  ;;  %p283_p2 = scmp.lt.s32.totalorder %s1621_s16, 4 }
  0x11   : > { %s1624_s21 = smov [#allocation8]   ;;  %s1625_s24 = smov [#allocation7]  }
  0x12   : > { %p1717_p3 = pnand %p1071_p0, %p283_p2  ;;  %s327_s22 = sshll.u32 %s1624_s21, 4  ;;  %s1729_s22 = int_to_ptr.vmem [resolvable:$true] %s327_s22 }
  0x13   : > { %s311_s25 = sshll.u32 %s1625_s24, 4  ;;  %s2087_s1 = sld [smem:[#allocation20_spill]]  ;;  %s1731_s25 = int_to_ptr.vmem [resolvable:$true] %s311_s25 }
  0x14   : > { %s2085_s20 = scalar_select %p1717_p3, 1, 0 }
  0x15   : > { %p1267_p4 = pneg %p1717_p3 }
  0x17   : > { %p1725_p5 = pnand %p1267_p4, %p2078_p1 }
  0x19   : > { %s1373_s28 = scalar_lea.hbm %s2087_s1, 1024  ;;  %p1741_p7 = pneg %p1725_p5 }
  0x1a   : > { %p1374_p6 = scmp.ne.s32.totalorder %s2087_s1, %s1373_s28  ;;  %p1380_p10 = scmp.lt.u32.totalorder %s1373_s28, %s2087_s1 }
  0x1c   : > { %p1376_p8 = pnand %p1741_p7, %p1374_p6 }
  0x1e   : > { %p1377_p9 = pneg %p1376_p8 }
  0x20   : > { %p1382_p11 = pnand %p1380_p10, %p1377_p9 }
  0x22   : > { %1385 = shalt.err (!%p1382_p11)
}
  0x23   : > { %s1386_s21 = scalar_lea.vmem %s1715_s18, 1024  ;;  %p1394_p2 = scmp.lt.s32.totalorder %s1715_s18, %s1715_s18 }
  0x24   : > { %p1387_p12 = scmp.ne.s32.totalorder %s1715_s18, %s1386_s21  ;;  %p1395_p4 = scmp.lt.s32.totalorder %s1386_s21, %s1386_s21 }
  0x26   : > { %p1389_p13 = pnand %p1387_p12, %p1741_p7  ;;  %p1396_p6 = por %p1395_p4, %p1394_p2 }
  0x28   : > { %p1390_p0 = pneg %p1389_p13 }
  0x2a   : > { %p1397_p8 = pnand %p1396_p6, %p1390_p0 }
  0x2c   : > { %1400 = shalt.err (!%p1397_p8)
}
  0x2d   : > { %s1626_s24 = smov 64   ;;  %s1627_s26 = smov 4  }
  0x2e   : > { %1270 = dma.hbm_to_vmem [thread:$0]  (!%p1725_p5), %s2087_s1, 1024, %s1715_s18, [#allocation6], %s1626_s24, %s1626_s24, %s1627_s26  }
  0x2f   : > { %s1401_s12 = scalar_lea.hbm %s2071_s5, 1024 }
  0x30   : > { %p1402_p9 = scmp.ne.s32.totalorder %s2071_s5, %s1401_s12  ;;  %p1408_p12 = scmp.lt.u32.totalorder %s1401_s12, %s2071_s5 }
  0x32   : > { %p1404_p10 = pnand %p1402_p9, %p1741_p7 }
  0x34   : > { %p1405_p11 = pneg %p1404_p10 }
  0x36   : > { %p1410_p13 = pnand %p1408_p12, %p1405_p11 }
  0x38   : > { %1413 = shalt.err (!%p1410_p13)
}
  0x39   : > { %s1414_s18 = scalar_lea.vmem %s1729_s22, 1024  ;;  %p1422_p6 = scmp.lt.s32.totalorder %s1729_s22, %s1729_s22 }
  0x3a   : > { %p1415_p0 = scmp.ne.s32.totalorder %s1729_s22, %s1414_s18  ;;  %p1423_p8 = scmp.lt.s32.totalorder %s1414_s18, %s1414_s18 }
  0x3c   : > { %p1417_p2 = pnand %p1415_p0, %p1741_p7  ;;  %p1424_p9 = por %p1423_p8, %p1422_p6 }
  0x3e   : > { %p1418_p4 = pneg %p1417_p2 }
  0x40   : > { %p1425_p10 = pnand %p1424_p9, %p1418_p4 }
  0x42   : > { %1428 = shalt.err (!%p1425_p10)
}
  0x43   : > { %1276 = dma.hbm_to_vmem [thread:$0]  (!%p1725_p5), %s2071_s5, 1024, %s1729_s22, [#allocation9], %s1626_s24, %s1626_s24, %s1627_s26  }
  0x44   : > { %s1429_s29 = scalar_lea.hbm %s2069_s3, 1024 }
  0x45   : > { %p1430_p11 = scmp.ne.s32.totalorder %s2069_s3, %s1429_s29  ;;  %p1436_p0 = scmp.lt.u32.totalorder %s1429_s29, %s2069_s3 }
  0x47   : > { %p1432_p12 = pnand %p1430_p11, %p1741_p7 }
  0x49   : > { %p1433_p13 = pneg %p1432_p12 }
  0x4b   : > { %p1438_p2 = pnand %p1436_p0, %p1433_p13 }
  0x4d   : > { %1441 = shalt.err (!%p1438_p2)
}
  0x4e   : > { %s1442_s22 = scalar_lea.vmem %s1731_s25, 1024  ;;  %p1450_p9 = scmp.lt.s32.totalorder %s1731_s25, %s1731_s25 }
  0x4f   : > { %p1443_p4 = scmp.ne.s32.totalorder %s1731_s25, %s1442_s22  ;;  %p1451_p10 = scmp.lt.s32.totalorder %s1442_s22, %s1442_s22 }
  0x51   : > { %p1445_p6 = pnand %p1443_p4, %p1741_p7  ;;  %p1452_p11 = por %p1451_p10, %p1450_p9 }
  0x53   : > { %p1446_p8 = pneg %p1445_p6 }
  0x55   : > { %p1453_p12 = pnand %p1452_p11, %p1446_p8 }
  0x57   : > { %1456 = shalt.err (!%p1453_p12)
}
  0x58   : > { %1273 = dma.hbm_to_vmem [thread:$0]  (!%p1725_p5), %s2069_s3, 1024, %s1731_s25, [#allocation6], %s1626_s24, %s1626_s24, %s1627_s26  }
  0x59   : > { %s1628_s10 = smov [#allocation10]   ;;  %s1457_s30 = scalar_lea.hbm %s2073_s7, 1024 }
  0x5a   : > { %s343_s27 = sshll.u32 %s1628_s10, 4  ;;  %p1458_p13 = scmp.ne.s32.totalorder %s2073_s7, %s1457_s30  ;;  %s344_s27 = int_to_ptr.vmem [resolvable:$true] %s343_s27 }
  0x5b   : > { %p1464_p4 = scmp.lt.u32.totalorder %s1457_s30, %s2073_s7 }
  0x5c   : > { %p1460_p0 = pnand %p1458_p13, %p1741_p7 }
  0x5e   : > { %p1461_p2 = pneg %p1460_p0 }
  0x60   : > { %p1466_p6 = pnand %p1464_p4, %p1461_p2 }
  0x62   : > { %1469 = shalt.err (!%p1466_p6)
}
  0x63   : > { %s1470_s25 = scalar_lea.vmem %s344_s27, 1024  ;;  %p1478_p11 = scmp.lt.s32.totalorder %s344_s27, %s344_s27 }
  0x64   : > { %p1471_p8 = scmp.ne.s32.totalorder %s344_s27, %s1470_s25  ;;  %p1479_p12 = scmp.lt.s32.totalorder %s1470_s25, %s1470_s25 }
  0x66   : > { %p1473_p9 = pnand %p1471_p8, %p1741_p7  ;;  %p1480_p1 = por %p1479_p12, %p1478_p11 }
  0x68   : > { %p1474_p10 = pneg %p1473_p9 }
  0x6a   : > { %p1481_p3 = pnand %p1480_p1, %p1474_p10 }
  0x6c   : > { %1484 = shalt.err (!%p1481_p3)
}
  0x6d   : > { %1279 = dma.hbm_to_vmem [thread:$0]  (!%p1725_p5), %s2073_s7, 1024, %s344_s27, [#allocation9], %s1626_s24, %s1626_s24, %s1627_s26  }
  0x6e   : > { %s1070_s23 = sadd.s32 4294967294, %s1621_s16   ;;  %s1840_s11 = sadd.s32 1, %s1621_s16  }
  0x6f   : > { %s36_s10 = ssub.s32 %s1621_s16, %s1840_s11  ;;  %s39_s28 = sadd.s32 1, %s1617_s15 }
  0x70   : > { %p37_p1 = scmp.eq.s32.totalorder %s36_s10, 0  ;;  %p46_p3 = scmp.ne.s32.totalorder %s1617_s15, %s1613_s14 }
  0x71   : > { %p47_p7 = scmp.eq.s32.totalorder %s1621_s16, 0  ;;  %p52_p13 = scmp.ne.s32.totalorder %s1613_s14, %s1609_s13 }
  0x72   : > { %s1851_s29 = scalar_select %p37_p1, %s1617_s15, %s39_s28  }
  0x73   : > { %p1853_p0 = por %p47_p7, %p46_p3  ;;  %p2090_p2 = scmp.eq.s32.totalorder %s1710_s19, 0 }
  0x74   : > { %p244_p4 = scmp.eq.s32.totalorder %s1710_s19, 2  ;;  %p250_p6 = scmp.eq.s32.totalorder %s1070_s23, 2 }
  0x75   : > { %p1859_p5 = por %p2090_p2, %p52_p13  ;;  %p1295_p8 = scmp.lt.s32.totalorder %s1621_s16, 3 }
  0x76   : > { %s360_s26 = sand.u32 1, %s1617_s15   ;;  %p1866_p9 = por %p244_p4, %p46_p3 }
  0x77   : > { %p1870_p10 = por %p250_p6, %p52_p13  ;;  %s1077_s17 = sshll.u32 %s360_s26, 2 }
  0x78   : > { %s2092_s27 = scalar_select %p1866_p9, 1, 0 }
  0x79   : > { %s2093_s12 = scalar_select %p1870_p10, 1, 0 }
  0x7a   : > { %s1078_s21 = sshll.u32 %s1621_s16, 6  ;;  %s2094_s0 = sld [smem:[#allocation19_spill]] }
  0x7b   : > { %s364_s8 = scalar_lea.vmem [#allocation2], %s1077_s17  ;;  %p1884_p11 = pnand %p1295_p8, %p1853_p0 }
  0x7c   : > { %s371_s23 = sshll.u32 %s364_s8, 4  ;;  %s361_s28 = scalar_lea.sflag [#allocation3], %s360_s26  ;;  %s1880_s23 = int_to_ptr.vmem [resolvable:$true] %s371_s23 }
  0x7d   : > { %p1487_p1 = pneg %p1884_p11 }
  0x80   : > { %s1878_s18 = scalar_lea.hbm %s2094_s0, %s1078_s21  ;;  %s1490_s22 = scalar_lea.hbm %s2094_s0, 192 }
  0x81   : > { %s1485_s1 = scalar_lea.hbm %s1878_s18, 64  ;;  %p1491_p13 = scmp.lt.u32.totalorder %s1878_s18, %s2094_s0 }
  0x82   : > { %p1486_p12 = scmp.ne.s32.totalorder %s1878_s18, %s1485_s1  ;;  %p1492_p0 = scmp.lt.u32.totalorder %s1490_s22, %s1485_s1 }
  0x83   : > { %p1494_p4 = scmp.lt.u32.totalorder %s1485_s1, %s1878_s18 }
  0x84   : > { %p1488_p3 = pnand %p1487_p1, %p1486_p12  ;;  %p1493_p2 = por %p1492_p0, %p1491_p13 }
  0x86   : > { %p1489_p7 = pneg %p1488_p3  ;;  %p1495_p6 = por %p1494_p4, %p1493_p2 }
  0x88   : > { %p1496_p8 = pnand %p1495_p6, %p1489_p7 }
  0x8a   : > { %1499 = shalt.err (!%p1496_p8)
}
  0x8b   : > { %s1500_s26 = scalar_lea.vmem %s1880_s23, 64  ;;  %s1629_s8 = smov [#allocation2]  }
  0x8c   : > { %p1501_p12 = scmp.ne.s32.totalorder %s1880_s23, %s1500_s26  ;;  %s1505_s17 = sshll.u32 %s1629_s8, 4  ;;  %s1506_s17 = int_to_ptr.vmem [resolvable:$false] %s1505_s17 }
  0x8d   : > { %s1507_s21 = scalar_lea.vmem %s1506_s17, 128  ;;  %p1508_p9 = scmp.lt.s32.totalorder %s1880_s23, %s1506_s17 }
  0x8e   : > { %p1503_p3 = pnand %p1501_p12, %p1487_p1  ;;  %p1509_p13 = scmp.lt.s32.totalorder %s1507_s21, %s1500_s26 }
  0x90   : > { %p1504_p10 = pneg %p1503_p3  ;;  %p1510_p0 = por %p1509_p13, %p1508_p9 }
  0x92   : > { %p1511_p2 = pnand %p1510_p0, %p1504_p10 }
  0x94   : > { %1514 = shalt.err (!%p1511_p2)
}
  0x95   : > { %1283 = dma.hbm_to_vmem [thread:$0]  (!%p1884_p11), %s1878_s18, 64, %s1880_s23, %s361_s28  }
  0x96   : > { %p2096_p7 = scmp.ne.s32.totalorder %s2085_s20, 0 }
  0x97   : > { %s1916_s1 = sand.u32 (!%p2096_p7), 1, %s1613_s14  }
  0x98   : > { %380 = sbr.rel (%p2096_p7) target bundleno = 1082 (0x43a), region = 56  ;;  %s1080_s22 = sshll.u32 (!%p2096_p7), %s1916_s1, 2 }
  0x99   : > { %s383_s30 = scalar_lea.sflag (!%p2096_p7), [#allocation3], %s1916_s1  ;;  %s1920_s25 = scalar_lea.vmem (!%p2096_p7), [#allocation2], %s1080_s22 }
  0x9f   : > { %1588 = dma.done.wait (%p1859_p5), %s383_s30, 64  }
  0xa0   : > { %1590 = vsyncadd (%p1859_p5), %s383_s30, 4294967232  ;;  %p2097_p9 = scmp.eq.s32.totalorder %s1710_s19, 0 }
  0xa2   : > { %1592 = dma.done.wait (%p2097_p9), [#allocation6], 2048   ;;  %p2098_p10 = pmov %p2097_p9 }
  0xa3   : > { %p2099_p11 = pmov %p2097_p9 }
  0xa4   : > { %1594 = vsyncadd (%p2098_p10), [#allocation6], 4294965248 }
  0xa5   : > { %1596 = dma.done.wait (%p2099_p11), [#allocation9], 2048   ;;  %p2100_p1 = pmov %p2097_p9 }
  0xa6   : > { %v1630_v0 = vmov 0.0   ;;  %vm1631_vm0 = vmmov 0   ;;  %v1341_v1 = vld [vmem:[#allocation5] sm:$0xff]   ;;  %v1342_v2 = vld [vmem:[#allocation5 + $0x8] sm:$0xff]   ;;  %v1343_v3 = vld [vmem:[#allocation5 + $0x10] sm:$0xff]   ;;  %s1085_s26 = sshll.u32 %s1916_s1, 3 }
  0xa7   : > { %1598 = vsyncadd (%p2100_p1), [#allocation9], 4294965248  ;;  %1165 = vmatprep.subr.bf16.mxu0 %v1630_v0  ;;  %1181 = vmatprep.mubr.msk.bf16.mxu0 %vm1631_vm0, %v1630_v0  ;;  %v1349_v4 = vld [vmem:[#allocation7] sm:$0xff]   ;;  %v1344_v5 = vld [vmem:[#allocation5 + $0x18] sm:$0xff]   ;;  %s436_s8 = scalar_lea.vmem [#allocation11], %s1085_s26  ;;  %s1125_s17 = sshll.u32 %s1710_s19, 7 }
  0xa8   : > { %1185 = vmatprep.subr.bf16.mxu1 %v1630_v0  ;;  %1201 = vmatprep.mubr.msk.bf16.mxu1 %vm1631_vm0, %v1630_v0  ;;  %v1350_v6 = vld [vmem:[#allocation7 + $0x8] sm:$0xff]   ;;  %v1345_v7 = vld [vmem:[#allocation5 + $0x20] sm:$0xff]   ;;  %v1351_v8 = vld [vmem:[#allocation7 + $0x10] sm:$0xff]   ;;  %s917_s21 = sshll.u32 %s436_s8, 4  ;;  %s899_s20 = scalar_lea.sflag [#allocation4], %s1916_s1  ;;  %s918_s21 = int_to_ptr.vmem [resolvable:$true] %s917_s21 }
  0xa9   : > { %1166 = vmatpush3.bf16.msra.mxu0 %v1341_v1  ;;  %1186 = vmatpush3.bf16.msra.mxu1 %v1349_v4  ;;  %v1346_v9 = vld [vmem:[#allocation5 + $0x28] sm:$0xff]   ;;  %v1352_v10 = vld [vmem:[#allocation7 + $0x18] sm:$0xff]   ;;  %v1347_v11 = vld [vmem:[#allocation5 + $0x30] sm:$0xff]   ;;  %s1515_s24 = scalar_lea.vmem %s918_s21, 128  ;;  %p2101_p4 = scmp.ne.s32.totalorder %s2092_s27, 0 }
  0xaa   : > { %1167 = vmatprep.subr.bf16.mxu0 %v1630_v0  ;;  %1187 = vmatprep.subr.bf16.mxu1 %v1630_v0  ;;  %v1353_v12 = vld [vmem:[#allocation7 + $0x20] sm:$0xff]   ;;  %v1348_v13 = vld [vmem:[#allocation5 + $0x38] sm:$0xff]   ;;  %v1354_v14 = vld [vmem:[#allocation7 + $0x28] sm:$0xff]   ;;  %p1516_p5 = scmp.ne.s32.totalorder %s918_s21, %s1515_s24  ;;  %s1632_s18 = smov [#allocation11]  }
  0xab   : > { %v445_v15 = vld [vmem:[%s1920_s25] sm:$0xf]  ;;  %v1355_v16 = vld [vmem:[#allocation7 + $0x30] sm:$0xff]   ;;  %v1357_v18 = vld [vmem:[#allocation8] sm:$0xff]   ;;  %s1993_s25 = scalar_lea.hbm %s2075_s9, %s1125_s17  ;;  %s1519_s23 = sshll.u32 %s1632_s18, 4  ;;  %s1520_s23 = int_to_ptr.vmem [resolvable:$false] %s1519_s23 }
  0xac   : > { %v1356_v17 = vld [vmem:[#allocation7 + $0x38] sm:$0xff]   ;;  %v1358_v19 = vld [vmem:[#allocation8 + $0x8] sm:$0xff]   ;;  %v1359_v20 = vld [vmem:[#allocation8 + $0x10] sm:$0xff]   ;;  %p1517_p6 = pnand %p1516_p5, %p2101_p4  ;;  %s1521_s10 = scalar_lea.vmem %s1520_s23, 256 }
  0xad   : > { %1168 = vmatpush3.bf16.msra.mxu0 %v1342_v2  ;;  %1188 = vmatpush3.bf16.msra.mxu1 %v1350_v6  ;;  %v1360_v21 = vld [vmem:[#allocation8 + $0x18] sm:$0xff]   ;;  %v1361_v22 = vld [vmem:[#allocation8 + $0x20] sm:$0xff]   ;;  %v1362_v23 = vld [vmem:[#allocation8 + $0x28] sm:$0xff]   ;;  %p1522_p12 = scmp.lt.s32.totalorder %s918_s21, %s1520_s23  ;;  %p1523_p3 = scmp.lt.s32.totalorder %s1521_s10, %s1515_s24 }
  0xae   : > { %1169 = vmatprep.subr.bf16.mxu0 %v1630_v0  ;;  %1189 = vmatprep.subr.bf16.mxu1 %v1630_v0  ;;  %v1087_v24 = vld [vmem:[%s2068_s2] ss:$0 sm:$0xff]  ;;  %v1363_v32 = vld [vmem:[#allocation8 + $0x30] sm:$0xff]   ;;  %v1365_v34 = vld [vmem:[#allocation10] sm:$0xff]   ;;  %p1518_p8 = pneg %p1517_p6 }
  0xaf   : > { %v1364_v33 = vld [vmem:[#allocation8 + $0x38] sm:$0xff]   ;;  %v1366_v35 = vld [vmem:[#allocation10 + $0x8] sm:$0xff]   ;;  %v1367_v36 = vld [vmem:[#allocation10 + $0x10] sm:$0xff]   ;;  %p1524_p13 = por %p1523_p3, %p1522_p12 }
  0xb0   : > { %v1368_v37 = vld [vmem:[#allocation10 + $0x18] sm:$0xff]   ;;  %v1369_v38 = vld [vmem:[#allocation10 + $0x20] sm:$0xff]   ;;  %v1370_v39 = vld [vmem:[#allocation10 + $0x28] sm:$0xff]  }
  0xb1   : > { %1170 = vmatpush3.bf16.msra.mxu0 %v1343_v3  ;;  %1190 = vmatpush3.bf16.msra.mxu1 %v1351_v8  ;;  %v1096_v40 = vld [vmem:[%s2070_s4] ss:$0 sm:$0xff]  ;;  %v1371_v48 = vld [vmem:[#allocation10 + $0x30] sm:$0xff]   ;;  %p1525_p0 = pnand %p1524_p13, %p1518_p8 }
  0xb2   : > { %1171 = vmatprep.subr.bf16.mxu0 %v1630_v0  ;;  %1191 = vmatprep.subr.bf16.mxu1 %v1630_v0  ;;  %v1372_v49 = vld [vmem:[#allocation10 + $0x38] sm:$0xff]  }
  0xb3   : > { %v1105_v50 = vld [vmem:[%s2072_s6] ss:$0 sm:$0xff] }
  0xb5   : > { %1172 = vmatpush3.bf16.msra.mxu0 %v1344_v5  ;;  %1192 = vmatpush3.bf16.msra.mxu1 %v1352_v10 }
  0xb6   : > { %1173 = vmatprep.subr.bf16.mxu0 %v1630_v0  ;;  %1193 = vmatprep.subr.bf16.mxu1 %v1630_v0 }
  0xb9   : > { %1174 = vmatpush3.bf16.msra.mxu0 %v1345_v7  ;;  %1194 = vmatpush3.bf16.msra.mxu1 %v1353_v12 }
  0xba   : > { %1175 = vmatprep.subr.bf16.mxu0 %v1630_v0  ;;  %1195 = vmatprep.subr.bf16.mxu1 %v1630_v0 }
  0xbd   : > { %1176 = vmatpush3.bf16.msra.mxu0 %v1346_v9  ;;  %1196 = vmatpush3.bf16.msra.mxu1 %v1354_v14 }
  0xbe   : > { %1177 = vmatprep.subr.bf16.mxu0 %v1630_v0  ;;  %1197 = vmatprep.subr.bf16.mxu1 %v1630_v0 }
  0xc1   : > { %1178 = vmatpush3.bf16.msra.mxu0 %v1347_v11  ;;  %1198 = vmatpush3.bf16.msra.mxu1 %v1355_v16 }
  0xc2   : > { %1179 = vmatprep.subr.bf16.mxu0 %v1630_v0  ;;  %1199 = vmatprep.subr.bf16.mxu1 %v1630_v0 }
  0xc5   : > { %1180 = vmatpush3.bf16.msra.mxu0 %v1348_v13  ;;  %1200 = vmatpush3.bf16.msra.mxu1 %v1356_v17 }
  0xc6   : > { %1205 = vmatprep.subr.bf16.mxu0 %v1630_v0  ;;  %1225 = vmatprep.subr.bf16.mxu1 %v1630_v0 }
  0xc8   : > { %1182 = vmatmul.mubr.bf16.vlgmr.msra.gmra.mrb[0].mxu0 %v445_v15 }
  0xc9   : > { %1221 = vmatprep.mubr.msk.bf16.mxu0 %vm1631_vm0, %v1630_v0  ;;  %1206 = vmatpush3.bf16.msra.mxu0 %v1357_v18 }
  0xca   : > { %1207 = vmatprep.subr.bf16.mxu0 %v1630_v0 }
  0xcd   : > { %1208 = vmatpush3.bf16.msra.mxu0 %v1358_v19 }
  0xce   : > { %1209 = vmatprep.subr.bf16.mxu0 %v1630_v0 }
  0xd1   : > { %1210 = vmatpush3.bf16.msra.mxu0 %v1359_v20 }
  0xd2   : > { %1211 = vmatprep.subr.bf16.mxu0 %v1630_v0 }
  0xd5   : > { %1212 = vmatpush3.bf16.msra.mxu0 %v1360_v21 }
  0xd6   : > { %1213 = vmatprep.subr.bf16.mxu0 %v1630_v0 }
  0xd9   : > { %1214 = vmatpush3.bf16.msra.mxu0 %v1361_v22 }
  0xda   : > { %1215 = vmatprep.subr.bf16.mxu0 %v1630_v0 }
  0xdd   : > { %1216 = vmatpush3.bf16.msra.mxu0 %v1362_v23 }
  0xde   : > { %1217 = vmatprep.subr.bf16.mxu0 %v1630_v0 }
  0xe1   : > { %1218 = vmatpush3.bf16.msra.mxu0 %v1363_v32 }
  0xe2   : > { %1219 = vmatprep.subr.bf16.mxu0 %v1630_v0 }
  0xe5   : > { %1220 = vmatpush3.bf16.msra.mxu0 %v1364_v33 }
 0x19b   : > { %v551_v25 = vpop.f32.mrb[0].mxu0 }
 0x19c   : > { %v552_v26 = vadd.f32 %v1087_v24, %v551_v25  ;;  %v1183_v27 = vpop.f32.mrb[1].mxu0 }
 0x19d   : > { %v554_v28 = vpop.f32.mrb[2].mxu0 }
 0x19e   : > { %v557_v29 = vmax.f32 %v552_v26, 0.0  ;;  %v1184_v30 = vpop.f32.mrb[3].mxu0 }
 0x1a0   : > { %v558_v31 = vpack.c.bf16 %v557_v29, %v557_v29 }
 0x1a2   : > { %1202 = vmatmul.mubr.bf16.vlgmr.msra.gmra.mrb[0].mxu1 %v558_v31 }
 0x1a3   : > { %1241 = vmatprep.mubr.msk.bf16.mxu1 %vm1631_vm0, %v1630_v0  ;;  %1226 = vmatpush3.bf16.msra.mxu1 %v1365_v34 }
 0x1a4   : > { %1227 = vmatprep.subr.bf16.mxu1 %v1630_v0 }
 0x1a7   : > { %1228 = vmatpush3.bf16.msra.mxu1 %v1366_v35 }
 0x1a8   : > { %1229 = vmatprep.subr.bf16.mxu1 %v1630_v0 }
 0x1ab   : > { %1230 = vmatpush3.bf16.msra.mxu1 %v1367_v36 }
 0x1ac   : > { %1231 = vmatprep.subr.bf16.mxu1 %v1630_v0 }
 0x1af   : > { %1232 = vmatpush3.bf16.msra.mxu1 %v1368_v37 }
 0x1b0   : > { %1233 = vmatprep.subr.bf16.mxu1 %v1630_v0 }
 0x1b3   : > { %1234 = vmatpush3.bf16.msra.mxu1 %v1369_v38 }
 0x1b4   : > { %1235 = vmatprep.subr.bf16.mxu1 %v1630_v0 }
 0x1b7   : > { %1236 = vmatpush3.bf16.msra.mxu1 %v1370_v39 }
 0x1b8   : > { %1237 = vmatprep.subr.bf16.mxu1 %v1630_v0 }
 0x1bb   : > { %1238 = vmatpush3.bf16.msra.mxu1 %v1371_v48 }
 0x1bc   : > { %1239 = vmatprep.subr.bf16.mxu1 %v1630_v0 }
 0x1bf   : > { %1240 = vmatpush3.bf16.msra.mxu1 %v1372_v49 }
 0x275   : > { %v664_v41 = vpop.f32.mrb[0].mxu1 }
 0x276   : > { %v665_v42 = vadd.f32 %v1096_v40, %v664_v41  ;;  %v1203_v43 = vpop.f32.mrb[1].mxu1 }
 0x277   : > { %v667_v44 = vpop.f32.mrb[2].mxu1 }
 0x278   : > { %v670_v45 = vmax.f32 %v665_v42, 0.0  ;;  %v1204_v46 = vpop.f32.mrb[3].mxu1 }
 0x27a   : > { %v671_v47 = vpack.c.bf16 %v670_v45, %v670_v45 }
 0x27c   : > { %1222 = vmatmul.mubr.bf16.vlgmr.msra.gmra.mrb[4].mxu0 %v671_v47 }
 0x34f   : > { %v777_v51 = vpop.f32.mrb[4].mxu0 }
 0x350   : > { %v778_v52 = vadd.f32 %v1105_v50, %v777_v51  ;;  %v1223_v53 = vpop.f32.mrb[5].mxu0 }
 0x351   : > { %v780_v54 = vpop.f32.mrb[6].mxu0 }
 0x352   : > { %v783_v55 = vmax.f32 %v778_v52, 0.0  ;;  %v1224_v56 = vpop.f32.mrb[7].mxu0 }
 0x354   : > { %784 = vst [vmem:[%s436_s8] sm:$0xff] %v783_v55  ;;  %v785_v57 = vpack.c.bf16 %v783_v55, %v783_v55 }
 0x356   : > { %1242 = vmatmul.mubr.bf16.vlgmr.msra.gmra.mrb[4].mxu1 %v785_v57 }
 0x357   : > { %1528 = shalt.err (!%p1525_p0)
}
 0x358   : > { %s1529_s28 = scalar_lea.hbm %s1993_s25, 128  ;;  %s1533_s30 = scalar_lea.hbm %s2075_s9, 384 }
 0x359   : > { %p1530_p2 = scmp.ne.s32.totalorder %s1993_s25, %s1529_s28  ;;  %p1534_p10 = scmp.lt.u32.totalorder %s1993_s25, %s2075_s9 }
 0x35a   : > { %p1535_p11 = scmp.lt.u32.totalorder %s1533_s30, %s1529_s28  ;;  %p1537_p5 = scmp.lt.u32.totalorder %s1529_s28, %s1993_s25 }
 0x35b   : > { %p1531_p7 = pnand %p1530_p2, %p2101_p4 }
 0x35c   : > { %p1536_p1 = por %p1535_p11, %p1534_p10 }
 0x35d   : > { %p1532_p9 = pneg %p1531_p7 }
 0x35e   : > { %p1538_p6 = por %p1537_p5, %p1536_p1 }
 0x360   : > { %p1539_p8 = pnand %p1538_p6, %p1532_p9 }
 0x362   : > { %1542 = shalt.err (!%p1539_p8)
}
 0x363   : > { %1263 = dma.vmem_to_hbm [thread:$0]  (%p2101_p4), %s918_s21, 128, %s1993_s25, %s899_s20  }
 0x364   : > { %s2102_s8 = sld [smem:[#allocation21_spill]]  ;;  %s443_s22 = scalar_lea.vmem [#allocation12], %s1085_s26 }
 0x365   : > { %s930_s30 = sshll.u32 %s443_s22, 4  ;;  %s2103_s23 = sld [smem:[#allocation22_spill]]  ;;  %s2025_s30 = int_to_ptr.vmem [resolvable:$true] %s930_s30 }
 0x366   : > { %s904_s21 = scalar_lea.sflag [#allocation13], %s1916_s1  ;;  %s1543_s26 = scalar_lea.vmem %s2025_s30, 128 }
 0x367   : > { %p1544_p12 = scmp.ne.s32.totalorder %s2025_s30, %s1543_s26  ;;  %s1633_s19 = smov [#allocation12]  }
 0x368   : > { %s1547_s25 = sshll.u32 %s1633_s19, 4  ;;  %s1548_s25 = int_to_ptr.vmem [resolvable:$false] %s1547_s25 }
 0x369   : > { %p1545_p3 = pnand %p1544_p12, %p2101_p4  ;;  %s1549_s20 = scalar_lea.vmem %s1548_s25, 256 }
 0x36a   : > { %v1114_v58 = vld [vmem:[%s2102_s8] ss:$0 sm:$0xff]  ;;  %p1550_p0 = scmp.lt.s32.totalorder %s2025_s30, %s1548_s25  ;;  %p1551_p2 = scmp.lt.s32.totalorder %s1549_s20, %s1543_s26 }
 0x36b   : > { %s2023_s0 = scalar_lea.hbm %s2103_s23, %s1125_s17  ;;  %p1546_p13 = pneg %p1545_p3 }
 0x36c   : > { %p1552_p7 = por %p1551_p2, %p1550_p0 }
 0x36e   : > { %p1553_p9 = pnand %p1552_p7, %p1546_p13 }
 0x429   : > { %v891_v59 = vpop.f32.mrb[4].mxu1 }
 0x42a   : > { %v892_v60 = vadd.f32 %v1114_v58, %v891_v59  ;;  %v1243_v61 = vpop.f32.mrb[5].mxu1 }
 0x42b   : > { %v894_v62 = vpop.f32.mrb[6].mxu1 }
 0x42c   : > { %897 = vst [vmem:[%s443_s22] sm:$0xff] %v892_v60  ;;  %v1244_v63 = vpop.f32.mrb[7].mxu1 }
 0x42d   : > { %1556 = shalt.err (!%p1553_p9)
}
 0x42e   : > { %s1557_s1 = scalar_lea.hbm %s2023_s0, 128  ;;  %s1561_s10 = scalar_lea.hbm %s2103_s23, 384 }
 0x42f   : > { %p1558_p10 = scmp.ne.s32.totalorder %s2023_s0, %s1557_s1  ;;  %p1562_p5 = scmp.lt.u32.totalorder %s2023_s0, %s2103_s23 }
 0x430   : > { %p1563_p6 = scmp.lt.u32.totalorder %s1561_s10, %s1557_s1  ;;  %p1565_p12 = scmp.lt.u32.totalorder %s1557_s1, %s2023_s0 }
 0x431   : > { %p1559_p11 = pnand %p1558_p10, %p2101_p4 }
 0x432   : > { %p1564_p8 = por %p1563_p6, %p1562_p5 }
 0x433   : > { %p1560_p1 = pneg %p1559_p11 }
 0x434   : > { %p1566_p3 = por %p1565_p12, %p1564_p8 }
 0x436   : > { %p1567_p13 = pnand %p1566_p3, %p1560_p1 }
 0x438   : > { %1570 = shalt.err (!%p1567_p13)
}
 0x439   : > { %1264 = dma.vmem_to_hbm [thread:$0]  (%p2101_p4), %s2025_s30, 128, %s2023_s0, %s904_s21  }
 0x43a PF: > { %p1300_p0 = scmp.ge.s32.totalorder %s1621_s16, 2  ;;  %s942_s28 = sand.u32 1, %s1609_s13  }
 0x43b   : > { %p2104_p2 = scmp.ne.s32.totalorder %s2093_s12, 0  ;;  %s943_s18 = scalar_lea.sflag [#allocation4], %s942_s28 }
 0x43d   : > { %p1285_p7 = pnand %p1300_p0, %p2104_p2 }
 0x43f   : > { %1600 = dma.done.wait (!%p1285_p7), %s943_s18, 128  }
 0x440   : > { %1602 = vsyncadd (!%p1285_p7), %s943_s18, 4294967168  ;;  %s952_s26 = scalar_lea.sflag [#allocation13], %s942_s28 }
 0x441   : > { %1604 = dma.done.wait (!%p1285_p7), %s952_s26, 128  }
 0x442   : > { %1606 = vsyncadd (!%p1285_p7), %s952_s26, 4294967168  ;;  %p29_p4 = scmp.ge.s32.totalorder %s1840_s11, 5   ;;  %s2105_s13 = smov %s1613_s14 }
 0x443   : > { %s2106_s14 = smov %s1617_s15  ;;  %s2107_s15 = smov %s1851_s29 }
 0x444   : > { %s2108_s16 = smov %s1840_s11  ;;  %31 = sbr.rel (!%p29_p4) target bundleno = 14 (0xe), region = 134 }
 0x44b   :  { %957 = vsyncpa [#allocation3], 1 }
 0x44c   :  { %959 = vsyncpa [#allocation3 + $0x1], 1 }
 0x44d   :  { %960 = vsyncpa [#allocation6], 1 }
 0x44e   :  { %961 = vsyncpa [#allocation9], 1 }
 0x44f   :  { %962 = vsyncpa [#allocation4], 1 }
 0x450   :  { %964 = vsyncpa [#allocation4 + $0x1], 1 }
 0x451   :  { %965 = vsyncpa [#allocation13], 1 }
 0x452   :  { %967 = vsyncpa [#allocation13 + $0x1], 1 }

</bundles_post_ra>
